<compile_context>
chip_gen: v5e
topology: v5e:2x2
jax: 0.10.0
libtpu: 0.0.40
codegen_flags: <defaults>
</compile_context>

<pallas_src>
import functools

import jax
import jax.numpy as jnp
from jax.experimental import pallas as pl
from jax.experimental.pallas import tpu as pltpu


def _round_up(x: int, m: int) -> int:
    return ((x + m - 1) // m) * m


def _pick_tile(half_rows: int, target: int) -> int:
    """Largest multiple of 8 that divides `half_rows` and is <= target."""
    best = 8
    cand = 8
    limit = min(target, half_rows)
    while cand <= limit:
        if half_rows % cand == 0:
            best = cand
        cand += 8
    return best


def _ntxent_kernel(
    zjs_row_ref, zis_row_ref, zjs_col_ref, zis_col_ref,    # inputs
    out_ref,                                               # per-row losses
    xr_ref, m_ref, l_ref, pos_ref,                         # VMEM scratch
    *, inv_temp, batch, b_pad, tm, tn, nrb, ncb, normalize, compute_dtype,
):
    i = pl.program_id(0)              # row tile over concat([zjs, zis])
    j = pl.program_id(1)              # col tile over concat([zjs, zis])
    last_j = pl.num_programs(1) - 1

    row_is_zjs = i < nrb              # which half this row tile lives in
    col_is_zjs = j < ncb

    eps_sq = jnp.float32(1e-16)       # (torch CosineSimilarity eps=1e-8)**2

    @pl.when(j == 0)
    def _init_row_tile():
        zj = zjs_row_ref[...].astype(jnp.float32)
        zi = zis_row_ref[...].astype(jnp.float32)
        if normalize:
            zj = zj * jax.lax.rsqrt(
                jnp.maximum(jnp.sum(zj * zj, axis=-1, keepdims=True), eps_sq))
            zi = zi * jax.lax.rsqrt(
                jnp.maximum(jnp.sum(zi * zi, axis=-1, keepdims=True), eps_sq))
        # Row operand for the MXU: select the half this row tile belongs to.
        xr_ref[...] = jnp.where(row_is_zjs, zj, zi).astype(compute_dtype)
        # Positive logit for row r is <zjs_r, zis_r>/temp for BOTH halves.
        pos_ref[...] = jnp.sum(zj * zi, axis=-1, keepdims=True) * inv_temp
        m_ref[...] = jnp.full((tm, 1), -1e30, dtype=jnp.float32)
        l_ref[...] = jnp.zeros((tm, 1), dtype=jnp.float32)

    # ---- column tile: select half, normalize in f32, cast for the MXU ----
    cj = zjs_col_ref[...].astype(jnp.float32)
    ci = zis_col_ref[...].astype(jnp.float32)
    xc = jnp.where(col_is_zjs, cj, ci)
    if normalize:
        xc = xc * jax.lax.rsqrt(
            jnp.maximum(jnp.sum(xc * xc, axis=-1, keepdims=True), eps_sq))

    # (tm, D) x (tn, D) contracted on D -- no explicit transpose, f32 accumulate.
    s = jax.lax.dot_general(
        xr_ref[...], xc.astype(compute_dtype),
        dimension_numbers=(((1,), (1,)), ((), ())),
        preferred_element_type=jnp.float32,
    ) * inv_temp

    # ---- per-tile masks: self-similarity and zero-padded columns ----
    row_in_half = (i % nrb) * tm + jax.lax.broadcasted_iota(jnp.int32, (tm, tn), 0)
    col_in_half = (j % ncb) * tn + jax.lax.broadcasted_iota(jnp.int32, (tm, tn), 1)
    same_half = row_is_zjs == col_is_zjs
    mask = jnp.logical_and(same_half, row_in_half == col_in_half)
    if b_pad > batch:
        mask = jnp.logical_or(mask, col_in_half >= batch)
    s = jnp.where(mask, -jnp.inf, s)

    # ---- online logsumexp update (running max kept finite -> NaN-safe) ----
    m_prev = m_ref[...]
    m_new = jnp.maximum(m_prev, jnp.max(s, axis=-1, keepdims=True))
    alpha = jnp.exp(m_prev - m_new)
    l_ref[...] = alpha * l_ref[...] + jnp.sum(
        jnp.exp(s - m_new), axis=-1, keepdims=True)
    m_ref[...] = m_new

    @pl.when(j == last_j)
    def _finalize_row_tile():
        lse = m_ref[...] + jnp.log(l_ref[...])
        per_row = lse - pos_ref[...]
        if b_pad > batch:
            ridx = (i % nrb) * tm + jax.lax.broadcasted_iota(jnp.int32, (tm, 1), 0)
            per_row = jnp.where(ridx < batch, per_row, 0.0)
        out_ref[...] = per_row


def ntxent_loss(zis, zjs, temperature=0.5, *, use_cosine_similarity=True,
                block_rows=256, block_cols=512, compute_dtype=jnp.bfloat16):
    """NT-Xent loss.  zis, zjs: (B, D) embeddings of the two augmented views."""
    assert zis.ndim == 2 and zis.shape == zjs.shape
    batch, d = zis.shape
    n = 2 * batch

    # Pad each half up to a sublane multiple; padded rows/cols are masked
    # inside the kernel and excluded from the loss.
    b_pad = _round_up(batch, 8)
    if b_pad != batch:
        zis = jnp.pad(zis, ((0, b_pad - batch), (0, 0)))
        zjs = jnp.pad(zjs, ((0, b_pad - batch), (0, 0)))

    tm = _pick_tile(b_pad, block_rows)   # row tile (within one half)
    tn = _pick_tile(b_pad, block_cols)   # col tile (within one half)
    nrb = b_pad // tm
    ncb = b_pad // tn
    grid = (2 * nrb, 2 * ncb)

    kernel = functools.partial(
        _ntxent_kernel,
        inv_temp=float(1.0 / temperature), batch=batch, b_pad=b_pad,
        tm=tm, tn=tn, nrb=nrb, ncb=ncb,
        normalize=bool(use_cosine_similarity), compute_dtype=compute_dtype)

    # Row sources: both halves are always needed (row operand + positive pair).
    row_map = lambda i, j: (i % nrb, 0)
    # Column sources: clamp the inactive half's block index so it does not
    # trigger a fresh DMA on every step.
    zjs_col_map = lambda i, j: (jnp.minimum(j, ncb - 1), 0)
    zis_col_map = lambda i, j: (jnp.maximum(j - ncb, 0), 0)

    per_row = pl.pallas_call(
        kernel,
        out_shape=jax.ShapeDtypeStruct((2 * b_pad, 1), jnp.float32),
        grid=grid,
        in_specs=[
            pl.BlockSpec((tm, d), row_map),       # zjs rows (operand / partner)
            pl.BlockSpec((tm, d), row_map),       # zis rows (operand / partner)
            pl.BlockSpec((tn, d), zjs_col_map),   # zjs columns
            pl.BlockSpec((tn, d), zis_col_map),   # zis columns
        ],
        out_specs=pl.BlockSpec((tm, 1), lambda i, j: (i, 0)),
        scratch_shapes=[
            pltpu.VMEM((tm, d), compute_dtype),   # normalized row tile (MXU operand)
            pltpu.VMEM((tm, 1), jnp.float32),     # running row max
            pltpu.VMEM((tm, 1), jnp.float32),     # running sum-of-exp
            pltpu.VMEM((tm, 1), jnp.float32),     # positive logits
        ],
        compiler_params=pltpu.CompilerParams(
            dimension_semantics=("parallel", "arbitrary"),
            vmem_limit_bytes=64 * 1024 * 1024),
    )(zjs, zis, zjs, zis)

    # Tiny final reduction stays in plain JAX.
    return jnp.sum(per_row) / n


def _ntxent_ref(zis, zjs, temperature=0.5):
    # Pure-JAX reference mirroring the PyTorch forward.
    reps = jnp.concatenate([zjs, zis], axis=0)
    n = reps.shape[0]
    b = n // 2
    xn = reps / jnp.maximum(
        jnp.sqrt(jnp.sum(reps * reps, axis=-1, keepdims=True)), 1e-8)
    sim = jnp.dot(xn, xn.T, precision=jax.lax.Precision.HIGHEST) / temperature
    idx = jnp.arange(n)
    pos = sim[idx, (idx + b) % n]
    masked = jnp.where(jnp.eye(n, dtype=bool), -jnp.inf, sim)
    lse = jax.scipy.special.logsumexp(masked, axis=-1)
    return jnp.sum(lse - pos) / n


if __name__ == "__main__":
    key = jax.random.PRNGKey(0)
    k1, k2, k3, k4 = jax.random.split(key, 4)

    # Small shapes consistent with the module: batch=8, hidden=32.
    B, D = 8, 32
    zis = jax.random.normal(k1, (B, D), dtype=jnp.float32)
    zjs = jax.random.normal(k2, (B, D), dtype=jnp.float32)

    ref = jax.block_until_ready(_ntxent_ref(zis, zjs, temperature=0.5))

    # f32 MXU operands: tight check against the reference.
    out_f32 = jax.block_until_ready(
        ntxent_loss(zis, zjs, temperature=0.5, compute_dtype=jnp.float32))
    assert jnp.allclose(out_f32, ref, rtol=1e-3, atol=1e-3), (out_f32, ref)

    # Default bf16 MXU operands: looser tolerance (bf16 operand rounding).
    out_bf16 = jax.block_until_ready(ntxent_loss(zis, zjs, temperature=0.5))
    assert jnp.allclose(out_bf16, ref, rtol=5e-2, atol=5e-2), (out_bf16, ref)

    # Batch that is not a multiple of 8 exercises the padding / masking path.
    B2, D2 = 5, 32
    zis2 = jax.random.normal(k3, (B2, D2), dtype=jnp.float32)
    zjs2 = jax.random.normal(k4, (B2, D2), dtype=jnp.float32)
    ref2 = jax.block_until_ready(_ntxent_ref(zis2, zjs2, temperature=0.5))
    out2 = jax.block_until_ready(
        ntxent_loss(zis2, zjs2, temperature=0.5, compute_dtype=jnp.float32))
    assert jnp.allclose(out2, ref2, rtol=1e-3, atol=1e-3), (out2, ref2)

    print("KERNEL_OK")
</pallas_src>

<mosaic_0001>
module attributes {stable_mosaic.version = 11 : i64} {
  func.func @_ntxent_kernel(%arg0: i32, %arg1: i32, %arg2: memref<8x32xf32, #tpu.memory_space<vmem>>, %arg3: memref<8x32xf32, #tpu.memory_space<vmem>>, %arg4: memref<8x32xf32, #tpu.memory_space<vmem>>, %arg5: memref<8x32xf32, #tpu.memory_space<vmem>>, %arg6: memref<8x1xf32, #tpu.memory_space<vmem>>, %arg7: memref<8x32xf32, #tpu.memory_space<vmem>>, %arg8: memref<8x1xf32, #tpu.memory_space<vmem>>, %arg9: memref<8x1xf32, #tpu.memory_space<vmem>>, %arg10: memref<8x1xf32, #tpu.memory_space<vmem>>) attributes {dimension_semantics = [#tpu.dimension_semantics<parallel>, #tpu.dimension_semantics<arbitrary>], iteration_bounds = array<i64: 2, 2>, scalar_prefetch = 0 : i64, scratch_operands = 4 : i64, tpu.core_type = #tpu.core_type<tc>, window_params = [{transform_indices = @transform_0, window_bounds = array<i64: 8, 32>}, {transform_indices = @transform_1, window_bounds = array<i64: 8, 32>}, {transform_indices = @transform_2, window_bounds = array<i64: 8, 32>}, {transform_indices = @transform_3, window_bounds = array<i64: 8, 32>}, {transform_indices = @transform_4, window_bounds = array<i64: 8, 1>}]} {
    %c1_i32 = arith.constant 1 : i32
    %0 = arith.cmpi slt, %arg0, %c1_i32 : i32
    %c1_i32_0 = arith.constant 1 : i32
    %1 = arith.cmpi slt, %arg1, %c1_i32_0 : i32
    %c0_i32 = arith.constant 0 : i32
    %2 = arith.cmpi eq, %arg1, %c0_i32 : i32
    %3 = arith.extui %2 : i1 to i32
    %cst = arith.constant 1.000000e-16 : f32
    %c0_i32_1 = arith.constant 0 : i32
    %4 = arith.cmpi ne, %3, %c0_i32_1 : i32
    scf.if %4 {
      %c0_37 = arith.constant 0 : index
      %c0_38 = arith.constant 0 : index
      %74 = vector.load %arg2[%c0_37, %c0_38] : memref<8x32xf32, #tpu.memory_space<vmem>>, vector<8x32xf32>
      %c0_39 = arith.constant 0 : index
      %c0_40 = arith.constant 0 : index
      %75 = vector.load %arg3[%c0_39, %c0_40] : memref<8x32xf32, #tpu.memory_space<vmem>>, vector<8x32xf32>
      %76 = arith.mulf %74, %74 : vector<8x32xf32>
      %cst_41 = arith.constant dense<0.000000e+00> : vector<8xf32>
      %77 = vector.multi_reduction <add>, %76, %cst_41 [1] : vector<8x32xf32> to vector<8xf32>
      %78 = vector.shape_cast %77 : vector<8xf32> to vector<8x1xf32>
      %79 = vector.broadcast %cst : f32 to vector<8x1xf32>
      %80 = arith.maximumf %78, %79 : vector<8x1xf32>
      %81 = math.rsqrt %80 : vector<8x1xf32>
      %82 = vector.broadcast %81 : vector<8x1xf32> to vector<8x32xf32>
      %83 = arith.mulf %74, %82 : vector<8x32xf32>
      %84 = arith.mulf %75, %75 : vector<8x32xf32>
      %cst_42 = arith.constant dense<0.000000e+00> : vector<8xf32>
      %85 = vector.multi_reduction <add>, %84, %cst_42 [1] : vector<8x32xf32> to vector<8xf32>
      %86 = vector.shape_cast %85 : vector<8xf32> to vector<8x1xf32>
      %87 = vector.broadcast %cst : f32 to vector<8x1xf32>
      %88 = arith.maximumf %86, %87 : vector<8x1xf32>
      %89 = math.rsqrt %88 : vector<8x1xf32>
      %90 = vector.broadcast %89 : vector<8x1xf32> to vector<8x32xf32>
      %91 = arith.mulf %75, %90 : vector<8x32xf32>
      %92 = arith.select %0, %83, %91 : vector<8x32xf32>
      %c0_43 = arith.constant 0 : index
      %c0_44 = arith.constant 0 : index
      %93 = vector.load %arg7[%c0_43, %c0_44] : memref<8x32xf32, #tpu.memory_space<vmem>>, vector<8x32xf32>
      tpu.vector_store %arg7[%c0_43, %c0_44], %92 {strides = array<i32>} : memref<8x32xf32, #tpu.memory_space<vmem>>, vector<8x32xf32>,
      %94 = arith.mulf %83, %91 : vector<8x32xf32>
      %cst_45 = arith.constant dense<0.000000e+00> : vector<8xf32>
      %95 = vector.multi_reduction <add>, %94, %cst_45 [1] : vector<8x32xf32> to vector<8xf32>
      %96 = vector.shape_cast %95 : vector<8xf32> to vector<8x1xf32>
      %cst_46 = arith.constant 2.000000e+00 : f32
      %97 = vector.broadcast %cst_46 : f32 to vector<8x1xf32>
      %98 = arith.mulf %96, %97 : vector<8x1xf32>
      %c0_47 = arith.constant 0 : index
      %c0_48 = arith.constant 0 : index
      %99 = vector.load %arg10[%c0_47, %c0_48] : memref<8x1xf32, #tpu.memory_space<vmem>>, vector<8x1xf32>
      tpu.vector_store %arg10[%c0_47, %c0_48], %98 {strides = array<i32>} : memref<8x1xf32, #tpu.memory_space<vmem>>, vector<8x1xf32>,
      %cst_49 = arith.constant -1.000000e+30 : f32
      %100 = vector.broadcast %cst_49 : f32 to vector<8x1xf32>
      %c0_50 = arith.constant 0 : index
      %c0_51 = arith.constant 0 : index
      %101 = vector.load %arg8[%c0_50, %c0_51] : memref<8x1xf32, #tpu.memory_space<vmem>>, vector<8x1xf32>
      tpu.vector_store %arg8[%c0_50, %c0_51], %100 {strides = array<i32>} : memref<8x1xf32, #tpu.memory_space<vmem>>, vector<8x1xf32>,
      %cst_52 = arith.constant 0.000000e+00 : f32
      %102 = vector.broadcast %cst_52 : f32 to vector<8x1xf32>
      %c0_53 = arith.constant 0 : index
      %c0_54 = arith.constant 0 : index
      %103 = vector.load %arg9[%c0_53, %c0_54] : memref<8x1xf32, #tpu.memory_space<vmem>>, vector<8x1xf32>
      tpu.vector_store %arg9[%c0_53, %c0_54], %102 {strides = array<i32>} : memref<8x1xf32, #tpu.memory_space<vmem>>, vector<8x1xf32>,
    } else {
    }
    %c0 = arith.constant 0 : index
    %c0_2 = arith.constant 0 : index
    %5 = vector.load %arg4[%c0, %c0_2] : memref<8x32xf32, #tpu.memory_space<vmem>>, vector<8x32xf32>
    %c0_3 = arith.constant 0 : index
    %c0_4 = arith.constant 0 : index
    %6 = vector.load %arg5[%c0_3, %c0_4] : memref<8x32xf32, #tpu.memory_space<vmem>>, vector<8x32xf32>
    %7 = arith.select %1, %5, %6 : vector<8x32xf32>
    %8 = arith.mulf %7, %7 : vector<8x32xf32>
    %cst_5 = arith.constant dense<0.000000e+00> : vector<8xf32>
    %9 = vector.multi_reduction <add>, %8, %cst_5 [1] : vector<8x32xf32> to vector<8xf32>
    %10 = vector.shape_cast %9 : vector<8xf32> to vector<8x1xf32>
    %cst_6 = arith.constant 1.000000e-16 : f32
    %11 = vector.broadcast %cst_6 : f32 to vector<8x1xf32>
    %12 = arith.maximumf %10, %11 : vector<8x1xf32>
    %13 = math.rsqrt %12 : vector<8x1xf32>
    %14 = vector.broadcast %13 : vector<8x1xf32> to vector<8x32xf32>
    %15 = arith.mulf %7, %14 : vector<8x32xf32>
    %c0_7 = arith.constant 0 : index
    %c0_8 = arith.constant 0 : index
    %16 = vector.load %arg7[%c0_7, %c0_8] : memref<8x32xf32, #tpu.memory_space<vmem>>, vector<8x32xf32>
    %cst_9 = arith.constant dense<0.000000e+00> : vector<8x8xf32>
    %17 = tpu.matmul %16, %15, %cst_9 {dimension_numbers = #tpu.dot_dimension_numbers<[1], [1], [0], [0], [0, 0, 1, 0], [], []>} : vector<8x32xf32>, vector<8x32xf32>, vector<8x8xf32> -> vector<8x8xf32>
    %cst_10 = arith.constant 2.000000e+00 : f32
    %18 = vector.broadcast %cst_10 : f32 to vector<8x8xf32>
    %19 = arith.mulf %17, %18 : vector<8x8xf32>
    %c1_i32_11 = arith.constant 1 : i32
    %c0_i32_12 = arith.constant 0 : i32
    %20 = arith.cmpi eq, %c1_i32_11, %c0_i32_12 : i32
    %c1_i32_13 = arith.constant 1 : i32
    %21 = arith.select %20, %c1_i32_13, %c1_i32_11 : i32
    %22 = arith.remsi %arg0, %21 : i32
    %c0_i32_14 = arith.constant 0 : i32
    %23 = arith.cmpi ne, %22, %c0_i32_14 : i32
    %c0_i32_15 = arith.constant 0 : i32
    %24 = arith.cmpi slt, %22, %c0_i32_15 : i32
    %c0_i32_16 = arith.constant 0 : i32
    %25 = arith.cmpi slt, %21, %c0_i32_16 : i32
    %26 = arith.xori %24, %25 : i1
    %27 = arith.andi %26, %23 : i1
    %28 = arith.addi %22, %21 : i32
    %29 = arith.select %27, %28, %22 : i32
    %c8_i32 = arith.constant 8 : i32
    %30 = arith.muli %29, %c8_i32 : i32
    %31 = tpu.iota {dimensions = array<i32: 0>} : vector<8x8xi32>
    %32 = vector.broadcast %30 : i32 to vector<8x8xi32>
    %33 = arith.addi %32, %31 : vector<8x8xi32>
    %c1_i32_17 = arith.constant 1 : i32
    %c0_i32_18 = arith.constant 0 : i32
    %34 = arith.cmpi eq, %c1_i32_17, %c0_i32_18 : i32
    %c1_i32_19 = arith.constant 1 : i32
    %35 = arith.select %34, %c1_i32_19, %c1_i32_17 : i32
    %36 = arith.remsi %arg1, %35 : i32
    %c0_i32_20 = arith.constant 0 : i32
    %37 = arith.cmpi ne, %36, %c0_i32_20 : i32
    %c0_i32_21 = arith.constant 0 : i32
    %38 = arith.cmpi slt, %36, %c0_i32_21 : i32
    %c0_i32_22 = arith.constant 0 : i32
    %39 = arith.cmpi slt, %35, %c0_i32_22 : i32
    %40 = arith.xori %38, %39 : i1
    %41 = arith.andi %40, %37 : i1
    %42 = arith.addi %36, %35 : i32
    %43 = arith.select %41, %42, %36 : i32
    %c8_i32_23 = arith.constant 8 : i32
    %44 = arith.muli %43, %c8_i32_23 : i32
    %45 = tpu.iota {dimensions = array<i32: 1>} : vector<8x8xi32>
    %46 = vector.broadcast %44 : i32 to vector<8x8xi32>
    %47 = arith.addi %46, %45 : vector<8x8xi32>
    %48 = arith.xori %0, %1 : i1
    %true = arith.constant true
    %49 = arith.xori %48, %true : i1
    %50 = arith.cmpi eq, %33, %47 : vector<8x8xi32>
    %51 = vector.broadcast %49 : i1 to vector<8x8xi1>
    %52 = arith.andi %51, %50 : vector<8x8xi1>
    %cst_24 = arith.constant 0xFF800000 : f32
    %53 = vector.broadcast %cst_24 : f32 to vector<8x8xf32>
    %54 = arith.select %52, %53, %19 : vector<8x8xi1>, vector<8x8xf32>
    %c0_25 = arith.constant 0 : index
    %c0_26 = arith.constant 0 : index
    %55 = vector.load %arg8[%c0_25, %c0_26] : memref<8x1xf32, #tpu.memory_space<vmem>>, vector<8x1xf32>
    %cst_27 = arith.constant dense<0xFF800000> : vector<8xf32>
    %56 = vector.multi_reduction <maximumf>, %54, %cst_27 [1] : vector<8x8xf32> to vector<8xf32>
    %57 = vector.shape_cast %56 : vector<8xf32> to vector<8x1xf32>
    %58 = arith.maximumf %55, %57 : vector<8x1xf32>
    %59 = arith.subf %55, %58 : vector<8x1xf32>
    %60 = math.exp %59 : vector<8x1xf32>
    %c0_28 = arith.constant 0 : index
    %c0_29 = arith.constant 0 : index
    %61 = vector.load %arg9[%c0_28, %c0_29] : memref<8x1xf32, #tpu.memory_space<vmem>>, vector<8x1xf32>
    %62 = arith.mulf %60, %61 : vector<8x1xf32>
    %63 = vector.broadcast %58 : vector<8x1xf32> to vector<8x8xf32>
    %64 = arith.subf %54, %63 : vector<8x8xf32>
    %65 = math.exp %64 : vector<8x8xf32>
    %cst_30 = arith.constant dense<0.000000e+00> : vector<8xf32>
    %66 = vector.multi_reduction <add>, %65, %cst_30 [1] : vector<8x8xf32> to vector<8xf32>
    %67 = vector.shape_cast %66 : vector<8xf32> to vector<8x1xf32>
    %68 = arith.addf %62, %67 : vector<8x1xf32>
    %c0_31 = arith.constant 0 : index
    %c0_32 = arith.constant 0 : index
    %69 = vector.load %arg9[%c0_31, %c0_32] : memref<8x1xf32, #tpu.memory_space<vmem>>, vector<8x1xf32>
    tpu.vector_store %arg9[%c0_31, %c0_32], %68 {strides = array<i32>} : memref<8x1xf32, #tpu.memory_space<vmem>>, vector<8x1xf32>,
    %c0_33 = arith.constant 0 : index
    %c0_34 = arith.constant 0 : index
    %70 = vector.load %arg8[%c0_33, %c0_34] : memref<8x1xf32, #tpu.memory_space<vmem>>, vector<8x1xf32>
    tpu.vector_store %arg8[%c0_33, %c0_34], %58 {strides = array<i32>} : memref<8x1xf32, #tpu.memory_space<vmem>>, vector<8x1xf32>,
    %c1_i32_35 = arith.constant 1 : i32
    %71 = arith.cmpi eq, %arg1, %c1_i32_35 : i32
    %72 = arith.extui %71 : i1 to i32
    %c0_i32_36 = arith.constant 0 : i32
    %73 = arith.cmpi ne, %72, %c0_i32_36 : i32
    scf.if %73 {
      %c0_37 = arith.constant 0 : index
      %c0_38 = arith.constant 0 : index
      %74 = vector.load %arg8[%c0_37, %c0_38] : memref<8x1xf32, #tpu.memory_space<vmem>>, vector<8x1xf32>
      %c0_39 = arith.constant 0 : index
      %c0_40 = arith.constant 0 : index
      %75 = vector.load %arg9[%c0_39, %c0_40] : memref<8x1xf32, #tpu.memory_space<vmem>>, vector<8x1xf32>
      %76 = math.log %75 : vector<8x1xf32>
      %77 = arith.addf %74, %76 : vector<8x1xf32>
      %c0_41 = arith.constant 0 : index
      %c0_42 = arith.constant 0 : index
      %78 = vector.load %arg10[%c0_41, %c0_42] : memref<8x1xf32, #tpu.memory_space<vmem>>, vector<8x1xf32>
      %79 = arith.subf %77, %78 : vector<8x1xf32>
      %c0_43 = arith.constant 0 : index
      %c0_44 = arith.constant 0 : index
      %80 = vector.load %arg6[%c0_43, %c0_44] : memref<8x1xf32, #tpu.memory_space<vmem>>, vector<8x1xf32>
      tpu.vector_store %arg6[%c0_43, %c0_44], %79 {strides = array<i32>} : memref<8x1xf32, #tpu.memory_space<vmem>>, vector<8x1xf32>,
    } else {
    }
    return
  }
  func.func @transform_0(%arg0: i32, %arg1: i32) -> (i32, i32) {
    %c1_i32 = arith.constant 1 : i32
    %c0_i32 = arith.constant 0 : i32
    %0 = arith.cmpi eq, %c1_i32, %c0_i32 : i32
    %c1_i32_0 = arith.constant 1 : i32
    %1 = arith.select %0, %c1_i32_0, %c1_i32 : i32
    %2 = arith.remsi %arg0, %1 : i32
    %c0_i32_1 = arith.constant 0 : i32
    %3 = arith.cmpi ne, %2, %c0_i32_1 : i32
    %c0_i32_2 = arith.constant 0 : i32
    %4 = arith.cmpi slt, %2, %c0_i32_2 : i32
    %c0_i32_3 = arith.constant 0 : i32
    %5 = arith.cmpi slt, %1, %c0_i32_3 : i32
    %6 = arith.xori %4, %5 : i1
    %7 = arith.andi %6, %3 : i1
    %8 = arith.addi %2, %1 : i32
    %9 = arith.select %7, %8, %2 : i32
    %c0_i32_4 = arith.constant 0 : i32
    %c0_i32_5 = arith.constant 0 : i32
    return %9, %c0_i32_4 : i32, i32
  }
  func.func @transform_1(%arg0: i32, %arg1: i32) -> (i32, i32) {
    %c1_i32 = arith.constant 1 : i32
    %c0_i32 = arith.constant 0 : i32
    %0 = arith.cmpi eq, %c1_i32, %c0_i32 : i32
    %c1_i32_0 = arith.constant 1 : i32
    %1 = arith.select %0, %c1_i32_0, %c1_i32 : i32
    %2 = arith.remsi %arg0, %1 : i32
    %c0_i32_1 = arith.constant 0 : i32
    %3 = arith.cmpi ne, %2, %c0_i32_1 : i32
    %c0_i32_2 = arith.constant 0 : i32
    %4 = arith.cmpi slt, %2, %c0_i32_2 : i32
    %c0_i32_3 = arith.constant 0 : i32
    %5 = arith.cmpi slt, %1, %c0_i32_3 : i32
    %6 = arith.xori %4, %5 : i1
    %7 = arith.andi %6, %3 : i1
    %8 = arith.addi %2, %1 : i32
    %9 = arith.select %7, %8, %2 : i32
    %c0_i32_4 = arith.constant 0 : i32
    %c0_i32_5 = arith.constant 0 : i32
    return %9, %c0_i32_4 : i32, i32
  }
  func.func @transform_2(%arg0: i32, %arg1: i32) -> (i32, i32) {
    %c0_i32 = arith.constant 0 : i32
    %0 = arith.minsi %arg1, %c0_i32 : i32
    %c0_i32_0 = arith.constant 0 : i32
    %c0_i32_1 = arith.constant 0 : i32
    return %0, %c0_i32_0 : i32, i32
  }
  func.func @transform_3(%arg0: i32, %arg1: i32) -> (i32, i32) {
    %c1_i32 = arith.constant 1 : i32
    %0 = arith.subi %arg1, %c1_i32 : i32
    %c0_i32 = arith.constant 0 : i32
    %1 = arith.maxsi %0, %c0_i32 : i32
    %c0_i32_0 = arith.constant 0 : i32
    %c0_i32_1 = arith.constant 0 : i32
    return %1, %c0_i32_0 : i32, i32
  }
  func.func @transform_4(%arg0: i32, %arg1: i32) -> (i32, i32) {
    %c0_i32 = arith.constant 0 : i32
    %c0_i32_0 = arith.constant 0 : i32
    return %arg0, %c0_i32 : i32, i32
  }
}

</mosaic_0001>

<bundles_post_ra>
// kernel: tpu_custom_call.1
= control target key start
LH: loop header
LB: loop body
LE: loop exit
PB: predicated region body
PF: predicated region fallthrough
CT: control target
= control target key end

     0   :  { %s1228_s0 = inlined_call_operand.hbm [shape: f32[8,32], index: 0, kind: input, shape index: {}]   ;;  %s1229_s1 = inlined_call_operand.hbm [shape: f32[8,32], index: 1, kind: input, shape index: {}]   ;;  %s1230_s2 = inlined_call_operand.hbm [shape: f32[8,32], index: 2, kind: input, shape index: {}]   ;;  %s1231_s3 = inlined_call_operand.hbm [shape: f32[8,32], index: 3, kind: input, shape index: {}]   ;;  %s1232_s4 = inlined_call_operand.vmem [shape: f32[16,1], index: 4, kind: output, shape index: {}]  }
   0x1   :  { %1234 = sst [smem:[#allocation16_spill]] %s1228_s0 }
   0x2   :  { %9 = vsyncpa [#allocation7], 0 }
   0x3   :  { %10 = vsyncpa [#allocation9], 0  ;;  %s1003_s15 = smov 0   ;;  %s1005_s16 = smov 0  }
   0x4   :  { %s1007_s17 = smov 0   ;;  %s1009_s18 = smov 0  }
   0x5   :  { %s1011_s19 = smov 0   ;;  %s1013_s20 = smov 0  }
   0x6   :  { %s1015_s21 = smov 0   ;;  %s1017_s22 = smov 0  }
   0x7   :  { %s1019_s23 = smov 0  }
   0x8 LB: > { %s1233_s24 = sadd.s32 4294967295, %s969_s23   ;;  %p94_p0 = scmp.ne.s32.totalorder %s949_s18, %s945_s17  ;;  %s969_s23 = sphi %s1019_s23, %s16_s23   ;;  %s965_s22 = sphi %s1017_s22, %s1248_s22   ;;  %s961_s21 = sphi %s1015_s21, %s1247_s21   ;;  %s957_s20 = sphi %s1013_s20, %s1246_s20   ;;  %s953_s19 = sphi %s1011_s19, %s1245_s19   ;;  %s949_s18 = sphi %s1009_s18, %s1212_s18   ;;  %s945_s17 = sphi %s1007_s17, %s1244_s17   ;;  %s941_s16 = sphi %s1005_s16, %s1207_s16   ;;  %s937_s15 = sphi %s1003_s15, %s1243_s15  }
   0x9   : > { %p1048_p1 = scmp.eq.s32.totalorder %s1233_s24, 0  ;;  %p126_p2 = scmp.ne.s32.totalorder %s941_s16, %s937_s15 }
   0xa   : > { %p591_p3 = scmp.ge.s32.totalorder %s969_s23, 1  ;;  %p163_p4 = scmp.lt.s32.totalorder %s969_s23, 5 }
   0xb   : > { %p1057_p5 = por %p1048_p1, %p94_p0  ;;  %p1063_p6 = por %p126_p2, %p1048_p1 }
   0xc   : > { %p1067_p7 = pnand %p591_p3, %p163_p4  ;;  %s1239_s0 = sld [smem:[#allocation16_spill]] }
   0xd   : > { %s971_s6 = smov [#allocation6]   ;;  %s25_s9 = sadd.s32 1, %s961_s21 }
   0xe   : > { %p627_p8 = pneg %p1067_p7  ;;  %s177_s7 = sshll.u32 %s971_s6, 4  ;;  %s178_s7 = int_to_ptr.vmem [resolvable:$true] %s177_s7 }
   0xf   : > { %p26_p10 = scmp.ge.s32.totalorder %s25_s9, 2  ;;  %s28_s10 = sadd.s32 1, %s965_s22 }
  0x10   : > { %p1078_p9 = pnand %p627_p8, %p1048_p1  ;;  %p933_p12 = scmp.ne.s32.totalorder %s949_s18, 0 }
  0x11   : > { %s1250_s9 = smov (%p26_p10, %s25_s9), 0  ;;  %s1252_s10 = smov (!%p26_p10, %s28_s10), %s965_s22 }
  0x12   : > { %s175_s5 = sshll.u32 %s1239_s0, 4  ;;  %p30_p11 = scmp.ge.s32.totalorder %s1252_s10, 2  ;;  %s176_s5 = int_to_ptr.hbm [resolvable:$true] %s175_s5 }
  0x13   : > { %630 = dma.hbm_to_vmem [thread:$0]  (!%p1078_p9), %s176_s5, 128, %s178_s7, [#allocation7]  }
  0x14   : > { %p89_p13 = scmp.eq.s32.totalorder %s969_s23, 0  ;;  %s1254_s10 = smov (%p30_p11, %s1252_s10), 0 }
  0x15   : > { %p643_p2 = scmp.lt.s32.totalorder %s969_s23, 4  ;;  %s200_s11 = sand.u32 1, %s969_s23  }
  0x16   : > { %p90_p0 = por %p933_p12, %p89_p13  ;;  %s212_s14 = sshll.u32 %s1230_s2, 4  ;;  %s213_s14 = int_to_ptr.hbm [resolvable:$true] %s212_s14 }
  0x17   : > { %s972_s15 = smov [#allocation10]   ;;  %s187_s6 = sshll.u32 %s1229_s1, 4  ;;  %s188_s6 = int_to_ptr.hbm [resolvable:$true] %s187_s6 }
  0x18   : > { %s214_s17 = sshll.u32 %s972_s15, 4  ;;  %p1102_p3 = pnand %p643_p2, %p90_p0  ;;  %s215_s17 = int_to_ptr.vmem [resolvable:$true] %s214_s17 }
  0x19   : > { %s1109_s7 = scalar_lea.sflag [#allocation7], %s200_s11  ;;  %s783_s24 = sshra.s32 %s213_s14, 4  ;;  %s784_s24 = int_to_ptr.hbm [resolvable:$true] %s783_s24 }
  0x1a   : > { %s785_s12 = scalar_lea.hbm %s784_s24, 8  ;;  %p787_p8 = pneg %p1102_p3 }
  0x1b   : > { %p786_p4 = scmp.ne.s32.totalorder %s784_s24, %s785_s12  ;;  %s790_s0 = scalar_lea.hbm %s1230_s2, 8 }
  0x1c   : > { %p792_p12 = scmp.lt.s32.totalorder %s790_s0, %s785_s12 }
  0x1d   : > { %p788_p10 = pnand %p787_p8, %p786_p4 }
  0x1f   : > { %p789_p11 = pneg %p788_p10 }
  0x21   : > { %p794_p0 = pnand %p792_p12, %p789_p11 }
  0x23   : > { %797 = shalt.err (!%p794_p0)
}
  0x24   : > { %637 = dma.hbm_to_vmem [thread:$0]  (!%p1102_p3), %s213_s14, 128, %s215_s17, %s1109_s7  }
  0x25   : > { %s973_s24 = smov [#allocation8]   ;;  %p934_p4 = scmp.ne.s32.totalorder %s941_s16, 0 }
  0x26   : > { %s189_s11 = sshll.u32 %s973_s24, 4  ;;  %s974_s30 = smov [#allocation11]   ;;  %s190_s11 = int_to_ptr.vmem [resolvable:$true] %s189_s11 }
  0x27   : > { %633 = dma.hbm_to_vmem [thread:$0]  (!%p1078_p9), %s188_s6, 128, %s190_s11, [#allocation9]  }
  0x28   : > { %p122_p8 = por %p934_p4, %p89_p13  ;;  %s236_s0 = sshll.u32 %s974_s30, 4  ;;  %s237_s0 = int_to_ptr.vmem [resolvable:$true] %s236_s0 }
  0x29   : > { %s234_s29 = sshll.u32 %s1231_s3, 4  ;;  %s235_s29 = int_to_ptr.hbm [resolvable:$true] %s234_s29 }
  0x2a   : > { %p638_p10 = pnand %p643_p2, %p122_p8  ;;  %s843_s13 = sshra.s32 %s235_s29, 4  ;;  %s844_s13 = int_to_ptr.hbm [resolvable:$true] %s843_s13 }
  0x2b   : > { %s845_s14 = scalar_lea.hbm %s844_s13, 8  ;;  %p851_p13 = scmp.lt.s32.totalorder %s844_s13, %s1231_s3 }
  0x2c   : > { %p846_p3 = scmp.ne.s32.totalorder %s844_s13, %s845_s14  ;;  %p847_p11 = pneg %p638_p10 }
  0x2e   : > { %p848_p12 = pnand %p847_p11, %p846_p3 }
  0x30   : > { %p849_p9 = pneg %p848_p12 }
  0x32   : > { %p854_p0 = pnand %p851_p13, %p849_p9 }
  0x34   : > { %857 = shalt.err (!%p854_p0)
}
  0x35   : > { %640 = dma.hbm_to_vmem [thread:$0]  (!%p638_p10), %s235_s29, 128, %s237_s0, %s1109_s7  }
  0x36   : > { %245 = sbr.rel (%p1067_p7) target bundleno = 1014 (0x3f6), region = 36 }
  0x3b   : > { %918 = dma.done.wait (%p1048_p1), [#allocation7], 128  }
  0x3c   : > { %920 = vsyncadd (%p1048_p1), [#allocation7], 4294967168 }
  0x3d   : > { %922 = dma.done.wait (%p1048_p1), [#allocation9], 128  }
  0x3e   : > { %924 = vsyncadd (%p1048_p1), [#allocation9], 4294967168  ;;  %s1242_s6 = sadd.s32 4294967295, %s969_s23   ;;  %s259_s15 = sand.u32 1, %s949_s18  }
  0x3f   : > { %s257_s7 = sand.u32 1, %s1242_s6   ;;  %s1146_s28 = sshll.u32 %s259_s15, 3 }
  0x40   : > { %s258_s24 = scalar_lea.sflag [#allocation7], %s257_s7  ;;  %s261_s11 = scalar_lea.vmem [#allocation10], %s1146_s28 }
  0x41   : > { %926 = dma.done.wait (%p1057_p5), %s258_s24, 128  }
  0x42   : > { %928 = vsyncadd (%p1057_p5), %s258_s24, 4294967168  ;;  %s269_s25 = sand.u32 1, %s941_s16  }
  0x43   : > { %s1154_s30 = sshll.u32 %s269_s25, 3 }
  0x44   : > { %s271_s0 = scalar_lea.vmem [#allocation11], %s1154_s30 }
  0x45   : > { %930 = dma.done.wait (%p1063_p6), %s258_s24, 128  }
  0x46   : > { %932 = vsyncadd (%p1063_p6), %s258_s24, 4294967168  ;;  %p306_p1 = scmp.lt.s32.totalorder %s957_s20, 1  ;;  %p311_p7 = scmp.lt.s32.totalorder %s953_s19, 1 }
  0x47   : > { %p606_p5 = scmp.ne.s32.totalorder %s953_s19, 0 }
  0x48   : > { %s307_s26 = scalar_select %p306_p1, %s957_s20, 1 }
  0x49   : > { %315 = sbr.rel (%p606_p5) target bundleno = 350 (0x15e), region = 56 }
  0x4a   : > { %s605_s5 = sshll.u32 %s307_s26, 3 }
  0x4b   : > { %s1169_s13 = scalar_lea.vmem %s1232_s4, %s605_s5 }
  0x4e   : > { %v316_v0 = vld [vmem:[#allocation6] sm:$0xff]  ;;  %vm319_vm0 = vcmask 261120   ;;  %v317_v2 = vld [vmem:[#allocation8] sm:$0xff]  ;;  %vm361_vm1 = vcmask 7168   ;;  %v975_v8 = vmov -1e+30  }
  0x4f   : > { %v318_v1 = vmul.f32 %v316_v0, %v316_v0  ;;  %v335_v4 = vmul.f32 %v317_v2, %v317_v2  ;;  %363 = vst.msk [vmem:[#allocation3] sm:$0xff] %vm361_vm1, %v975_v8  ;;  %v976_v9 = vmov 0.0   ;;  %s351_s27 = scalar_select %p306_p1, 1, 0 }
  0x50   : > { %364 = vst.msk [vmem:[#allocation4] sm:$0xff] %vm361_vm1, %v976_v9 }
  0x51   : > { %v320_v3 = vsel %vm319_vm0, %v318_v1, 0.0  ;;  %v336_v5 = vsel %vm319_vm0, %v335_v4, 0.0  ;;  %v352_v23 = vstv %s351_s27 }
  0x52   : > { %321 = vadd.xlane.f32.xlu0 %v320_v3  ;;  %vm353_vm8 = vcmp.eq.s32.totalorder %v352_v23, 1 }
  0x5a   : > { %337 = vadd.xlane.f32.xlu0 %v336_v5 }
  0xc5   : > { %v322_v6 = vpop.xlane.xlu0 %321 }
  0xc6   : > { %v323_v7 = vmax.f32 %v322_v6, 1e-16 }
  0xc8   : > { %739 = vrsqrt.f32 %v323_v7  ;;  %vm330_vm3 = vweird.f32 %v323_v7 }
  0xcd   : > { %v338_v10 = vpop.xlane.xlu0 %337 }
  0xce   : > { %v740_v11 = vpop.eup %739  ;;  %v339_v12 = vmax.f32 %v338_v10, 1e-16 }
  0xcf   : > { %v325_v13 = vmul.f32 %v740_v11, %v323_v7  ;;  %vm331_vm2 = vweird.f32 %v740_v11 }
  0xd0   : > { %741 = vrsqrt.f32 %v339_v12  ;;  %vm332_vm5 = vmor %vm330_vm3, %vm331_vm2  ;;  %vm346_vm6 = vweird.f32 %v339_v12 }
  0xd1   : > { %v326_v14 = vmul.f32 %v740_v11, %v325_v13 }
  0xd3   : > { %v327_v15 = vmul.f32 0.5, %v326_v14 }
  0xd5   : > { %v328_v17 = vsub.f32 1.5, %v327_v15 }
  0xd6   : > { %v742_v16 = vpop.eup %741 }
  0xd7   : > { %v341_v18 = vmul.f32 %v742_v16, %v339_v12  ;;  %v329_v21 = vmul.f32 %v740_v11, %v328_v17  ;;  %vm347_vm4 = vweird.f32 %v742_v16 }
  0xd8   : > { %vm348_vm7 = vmor %vm346_vm6, %vm347_vm4 }
  0xd9   : > { %v342_v19 = vmul.f32 %v742_v16, %v341_v18  ;;  %v333_v24 = vsel %vm332_vm5, %v740_v11, %v329_v21 }
  0xda   : > { %v334_v27 = vmul.f32 %v333_v24, %v316_v0 }
  0xdb   : > { %v343_v20 = vmul.f32 0.5, %v342_v19 }
  0xdd   : > { %v344_v22 = vsub.f32 1.5, %v343_v20 }
  0xdf   : > { %v345_v25 = vmul.f32 %v742_v16, %v344_v22 }
  0xe1   : > { %v349_v26 = vsel %vm348_vm7, %v742_v16, %v345_v25 }
  0xe2   : > { %v350_v28 = vmul.f32 %v349_v26, %v317_v2 }
  0xe4   : > { %v356_v29 = vmul.f32 %v350_v28, %v334_v27  ;;  %v354_v30 = vsel %vm353_vm8, %v334_v27, %v350_v28 }
  0xe5   : > { %355 = vst.msk [vmem:[#allocation2] sm:$0xff] %vm319_vm0, %v354_v30 }
  0xe6   : > { %v357_v31 = vsel %vm319_vm0, %v356_v29, 0.0 }
  0xe7   : > { %358 = vadd.xlane.f32.xlu1 %v357_v31 }
 0x15a   : > { %v359_v32 = vpop.xlane.xlu1 %358 }
 0x15b   : > { %v360_v33 = vmul.f32 2.0, %v359_v32 }
 0x15d   : > { %362 = vst.msk [vmem:[#allocation5] sm:$0xff] %vm361_vm1, %v360_v33 }
 0x15e PF: > { %s367_s14 = scalar_select %p311_p7, 1, 0  ;;  %v365_v34 = vld [vmem:[%s261_s11] sm:$0xff]  ;;  %v366_v35 = vld [vmem:[%s271_s0] sm:$0xff]  ;;  %vm372_vm10 = vcmask 261120   ;;  %v416_v51 = vlaneseq  ;;  %vm435_vm1 = vcmask 64512  }
 0x15f   : > { %v388_v50 = vld [vmem:[#allocation2] sm:$0xff]  ;;  %p609_p6 = scmp.ge.s32.totalorder %s957_s20, 1  ;;  %p610_p2 = scmp.ge.s32.totalorder %s953_s19, 1  ;;  %v977_v59 = vmov 0   ;;  %v434_v60 = vld [vmem:[#allocation3] sm:$0xff]  ;;  %vm457_vm2 = vcmask 7168  }
 0x160   : > { %v368_v36 = vstv %s367_s14  ;;  %v417_v52 = vshrl.u32 %v416_v51, 7  ;;  %v419_v53 = vand.u32 127, %v416_v51  ;;  %743 = vset.pattern.permute.xlu1 %v977_v59  ;;  %744 = vset.pattern.permute.xlu0 %v977_v59  ;;  %v443_v7 = vld [vmem:[#allocation4] sm:$0xff]  ;;  %p612_p12 = scmp.ne.s32.totalorder %s953_s19, 1 }
 0x161   : > { %vm369_vm9 = vcmp.eq.s32.totalorder %v368_v36, 1  ;;  %p422_p4 = pnand %p610_p2, %p306_p1  ;;  %p424_p8 = pnand %p609_p6, %p311_p7 }
 0x162   : > { %v370_v37 = vsel %vm369_vm9, %v365_v34, %v366_v35  ;;  %vm428_vm14 = vcmp.eq.s32.totalorder %v417_v52, %v419_v53 }
 0x163   : > { %v371_v38 = vmul.f32 %v370_v37, %v370_v37  ;;  %p423_p10 = pneg %p422_p4  ;;  %p425_p3 = pneg %p424_p8 }
 0x165   : > { %v373_v39 = vsel %vm372_vm10, %v371_v38, 0.0  ;;  %p426_p11 = por %p425_p3, %p423_p10 }
 0x166   : > { %374 = vadd.xlane.f32.xlu0 %v373_v39 }
 0x167   : > { %s611_s8 = scalar_select %p426_p11, 0, 1 }
 0x169   : > { %v430_v54 = vstv %s611_s8 }
 0x16a   : > { %vm431_vm15 = vcmp.eq.s32.totalorder %v430_v54, 1 }
 0x16b   : > { %vm432_vm0 = vmand %vm431_vm15, %vm428_vm14 }
 0x1d9   : > { %v375_v40 = vpop.xlane.xlu0 %374 }
 0x1da   : > { %v376_v41 = vmax.f32 %v375_v40, 1e-16 }
 0x1dc   : > { %745 = vrsqrt.f32 %v376_v41  ;;  %vm383_vm12 = vweird.f32 %v376_v41 }
 0x1e2   : > { %v746_v42 = vpop.eup %745 }
 0x1e3   : > { %v378_v43 = vmul.f32 %v746_v42, %v376_v41  ;;  %vm384_vm11 = vweird.f32 %v746_v42 }
 0x1e4   : > { %vm385_vm13 = vmor %vm383_vm12, %vm384_vm11 }
 0x1e5   : > { %v379_v44 = vmul.f32 %v746_v42, %v378_v43 }
 0x1e7   : > { %v380_v45 = vmul.f32 0.5, %v379_v44 }
 0x1e9   : > { %v381_v46 = vsub.f32 1.5, %v380_v45 }
 0x1eb   : > { %v382_v47 = vmul.f32 %v746_v42, %v381_v46 }
 0x1ed   : > { %v386_v48 = vsel %vm385_vm13, %v746_v42, %v382_v47 }
 0x1ee   : > { %v387_v49 = vmul.f32 %v386_v48, %v370_v37 }
 0x1f0   : > { %607 = vmatpush.xpose.msk.msra.mxu0 %vm372_vm10, %v387_v49 }
 0x1f3   : > { %608 = vmatmul.msk.f32.vlgmr.msra.gmra.mxu0 %vm372_vm10, %v388_v50 }
 0x270   : > { %v412_v55 = vpop.f32.mrf.mxu0 }
 0x271   : > { %v415_v56 = vmul.f32 2.0, %v412_v55 }
 0x273   : > { %v433_v57 = vsel %vm432_vm0, -inf, %v415_v56 }
 0x274   : > { %v436_v58 = vsel %vm435_vm1, %v433_v57, -inf }
 0x275   : > { %437 = vmax.xlane.f32.xlu0 %v436_v58 }
 0x2e8   : > { %v438_v61 = vpop.xlane.xlu0 %437 }
 0x2e9   : > { %v439_v62 = vmax.f32 %v434_v60, %v438_v61 }
 0x2eb   : > { %v440_v63 = vsub.f32 %v434_v60, %v439_v62  ;;  %459 = vst.msk [vmem:[#allocation3] sm:$0xff] %vm457_vm2, %v439_v62  ;;  %447 = vperm.xlu1 %743, %v439_v62  }
 0x2ed   : > { %v441_v5 = vmul.f32 1.442695, %v440_v63 }
 0x35d   : > { %v448_v0 = vpop.permute.xlu1 %447 }
 0x35e   : > { %v450_v1 = vsub.f32 %v433_v57, %v448_v0 }
 0x360   : > { %v451_v2 = vmul.f32 1.442695, %v450_v1 }
 0x362   : > { %747 = vpow2.f32 %v451_v2 }
 0x363   : > { %749 = vpow2.f32 %v441_v5 }
 0x368   : > { %v748_v3 = vpop.eup %747 }
 0x369   : > { %v453_v4 = vsel %vm435_vm1, %v748_v3, 0.0  ;;  %v750_v6 = vpop.eup %749 }
 0x36a   : > { %454 = vadd.xlane.f32.xlu1 %v453_v4  ;;  %v444_v8 = vmul.f32 %v750_v6, %v443_v7 }
 0x3dc   : > { %463 = sbr.rel (%p612_p12) target bundleno = 1014 (0x3f6), region = 60 }
 0x3dd   : > { %v455_v9 = vpop.xlane.xlu1 %454 }
 0x3de   : > { %v456_v10 = vadd.f32 %v455_v9, %v444_v8 }
 0x3e0   : > { %458 = vst.msk [vmem:[#allocation4] sm:$0xff] %vm457_vm2, %v456_v10 }
 0x3e1   : > { %v464_v13 = vld [vmem:[#allocation3] sm:$0xff]  ;;  %v469_v15 = vld [vmem:[#allocation5] sm:$0xff] }
 0x3e7   : > { %v465_v11 = vld [vmem:[#allocation4] sm:$0xff] }
 0x3e8   : > { %751 = vlog2.f32 %v465_v11 }
 0x3ee   : > { %v752_v12 = vpop.eup %751 }
 0x3ef   : > { %v467_v14 = vmul.f32 0.6931472, %v752_v12 }
 0x3f1   : > { %v468_v16 = vadd.f32 %v467_v14, %v464_v13 }
 0x3f3   : > { %v470_v17 = vsub.f32 %v468_v16, %v469_v15 }
 0x3f5   : > { %471 = vst.msk [vmem:[%s1169_s13] sm:$0xff] %vm457_vm2, %v470_v17 }
 0x3f6 PF: > { %s16_s23 = sadd.s32 1, %s969_s23   ;;  %s1243_s15 = smov %s941_s16 }
 0x3f7   : > { %p13_p9 = scmp.ge.s32.totalorder %s16_s23, 6   ;;  %s1207_s16 = smov 0  }
 0x3f8   : > { %s1244_s17 = smov %s949_s18  ;;  %s1212_s18 = smov 0  }
 0x3f9   : > { %s1245_s19 = smov %s961_s21  ;;  %s1246_s20 = smov %s965_s22 }
 0x3fa   : > { %s1247_s21 = smov %s1250_s9  ;;  %s1248_s22 = smov %s1254_s10 }
 0x3fb   :  { %15 = sbr.rel (!%p13_p9) target bundleno = 8 (0x8), region = 102 }
 0x400   :  { %491 = vsyncpa [#allocation7], 1 }
 0x401   :  { %493 = vsyncpa [#allocation7 + $0x1], 1 }
 0x402   :  { %494 = vsyncpa [#allocation9], 1 }

</bundles_post_ra>
